<compile_context>
chip_gen: v7x
topology: tpu7x:2x2x1
jax: 0.10.0
libtpu: 0.0.40
codegen_flags: <defaults>
</compile_context>

<pallas_src>
import jax
import jax.numpy as jnp
from jax.experimental import pallas as pl
from jax.experimental.pallas import tpu as pltpu


def _add_kernel(a_ref, b_ref, o_ref):
    # Full-tile elementwise add on the VPU.
    o_ref[...] = a_ref[...] + b_ref[...]


def _residual_add_impl(x247: jax.Array, x233: jax.Array) -> jax.Array:
    orig_shape = x247.shape
    n, c, h, w = orig_shape

    # Lane-dense 2-D view: sublane dim = N*C (144, multiple of 8),
    # lane dim = H*W (196, pads only to 256).
    a2 = x247.reshape(n * c, h * w)
    b2 = x233.reshape(n * c, h * w)

    vmem_spec = pl.BlockSpec(memory_space=pltpu.MemorySpace.VMEM)

    elems = a2.size
    itemsize = jnp.dtype(a2.dtype).itemsize
    cost = pl.CostEstimate(
        flops=elems,                      # one add per element
        transcendentals=0,
        bytes_accessed=3 * elems * itemsize,  # 2 reads + 1 write
    )

    out2 = pl.pallas_call(
        _add_kernel,
        out_shape=jax.ShapeDtypeStruct(a2.shape, a2.dtype),
        in_specs=[vmem_spec, vmem_spec],
        out_specs=vmem_spec,
        input_output_aliases={0: 0},      # output reuses x247's buffer
        cost_estimate=cost,
    )(a2, b2)

    return out2.reshape(orig_shape)


@jax.jit
def residual_add(x247: jax.Array, x233: jax.Array) -> jax.Array:
    assert x247.shape == x233.shape and x247.dtype == x233.dtype
    return _residual_add_impl(x247, x233)


if __name__ == "__main__":
    key = jax.random.PRNGKey(0)
    k1, k2 = jax.random.split(key)
    # Shapes match the PyTorch module's forward: [1, 144, 14, 14]
    x247 = jax.random.normal(k1, (1, 144, 14, 14), dtype=jnp.float32)
    x233 = jax.random.normal(k2, (1, 144, 14, 14), dtype=jnp.float32)

    # Reference computed before the kernel call (kernel output may alias
    # its first operand's buffer via input_output_aliases).
    ref = x247 + x233

    out = residual_add(x247, x233)
    jax.block_until_ready(out)

    assert out.shape == (1, 144, 14, 14)
    assert out.dtype == jnp.float32
    assert jnp.allclose(out, ref, atol=1e-6, rtol=1e-6)

    print("KERNEL_OK")
</pallas_src>

<mosaic_0001>
module attributes {stable_mosaic.version = 11 : i64} {
  func.func @_add_kernel(%arg0: memref<144x196xf32, #tpu.memory_space<vmem>>, %arg1: memref<144x196xf32, #tpu.memory_space<vmem>>, %arg2: memref<144x196xf32, #tpu.memory_space<vmem>>) attributes {dimension_semantics = [], scalar_prefetch = 0 : i64, scratch_operands = 0 : i64, tpu.core_type = #tpu.core_type<tc>} {
    %c0 = arith.constant 0 : index
    %c0_0 = arith.constant 0 : index
    %0 = vector.load %arg0[%c0, %c0_0] : memref<144x196xf32, #tpu.memory_space<vmem>>, vector<144x196xf32>
    %c0_1 = arith.constant 0 : index
    %c0_2 = arith.constant 0 : index
    %1 = vector.load %arg1[%c0_1, %c0_2] : memref<144x196xf32, #tpu.memory_space<vmem>>, vector<144x196xf32>
    %2 = arith.addf %0, %1 : vector<144x196xf32>
    %c0_3 = arith.constant 0 : index
    %c0_4 = arith.constant 0 : index
    %3 = vector.load %arg2[%c0_3, %c0_4] : memref<144x196xf32, #tpu.memory_space<vmem>>, vector<144x196xf32>
    tpu.vector_store %arg2[%c0_3, %c0_4], %2 {strides = array<i32>} : memref<144x196xf32, #tpu.memory_space<vmem>>, vector<144x196xf32>,
    return
  }
}

</mosaic_0001>

<bundles_post_ra>
// kernel: residual_add.1
= control target key start
LH: loop header
LB: loop body
LE: loop exit
PB: predicated region body
PF: predicated region fallthrough
CT: control target
= control target key end

     0   :  { %vm120_vm0 = vcmask 556032   ;;  %s517_s0 = inlined_call_operand.vmem [shape: f32[144,196], index: 0, kind: input, shape index: {}, may-alias: {0,2}]   ;;  %s518_s1 = inlined_call_operand.vmem [shape: f32[144,196], index: 1, kind: input, shape index: {}]   ;;  %s519_s2 = inlined_call_operand.vmem [shape: f32[144,196], index: 2, kind: output, shape index: {}, may-alias: {0,2}]  }
   0x1   :  { %v11_v0 = vld [vmem:[%s517_s0] sm:$0xff]  ;;  %v12_v2 = vld [vmem:[%s517_s0 + $0x8] sm:$0xff]  ;;  %v13_v5 = vld [vmem:[%s517_s0 + $0x10] sm:$0xff] }
   0x2   :  { %v47_v1 = vld [vmem:[%s518_s1] sm:$0xff]  ;;  %v48_v4 = vld [vmem:[%s518_s1 + $0x8] sm:$0xff]  ;;  %v49_v6 = vld [vmem:[%s518_s1 + $0x10] sm:$0xff] }
   0x3   :  { %v83_v3 = vadd.f32 %v47_v1, %v11_v0  ;;  %v84_v7 = vadd.f32 %v48_v4, %v12_v2  ;;  %v85_v8 = vadd.f32 %v49_v6, %v13_v5  ;;  %v14_v9 = vld [vmem:[%s517_s0 + $0x18] sm:$0xff]  ;;  %v15_v11 = vld [vmem:[%s517_s0 + $0x20] sm:$0xff]  ;;  %v52_v15 = vld [vmem:[%s518_s1 + $0x28] sm:$0xff] }
   0x4   :  { %v50_v10 = vld [vmem:[%s518_s1 + $0x18] sm:$0xff]  ;;  %v51_v13 = vld [vmem:[%s518_s1 + $0x20] sm:$0xff]  ;;  %v53_v19 = vld [vmem:[%s518_s1 + $0x30] sm:$0xff] }
   0x5   :  { %119 = vst [vmem:[%s519_s2] sm:$0xff] %v83_v3  ;;  %v86_v12 = vadd.f32 %v50_v10, %v14_v9  ;;  %v87_v16 = vadd.f32 %v51_v13, %v15_v11  ;;  %v54_v22 = vld [vmem:[%s518_s1 + $0x38] sm:$0xff]  ;;  %v55_v24 = vld [vmem:[%s518_s1 + $0x40] sm:$0xff]  ;;  %v56_v28 = vld [vmem:[%s518_s1 + $0x48] sm:$0xff] }
   0x6   :  { %v57_v31 = vld [vmem:[%s518_s1 + $0x50] sm:$0xff]  ;;  %v58_v33 = vld [vmem:[%s518_s1 + $0x58] sm:$0xff]  ;;  %v59_v37 = vld [vmem:[%s518_s1 + $0x60] sm:$0xff] }
   0x7   :  { %v60_v40 = vld [vmem:[%s518_s1 + $0x68] sm:$0xff]  ;;  %v61_v42 = vld [vmem:[%s518_s1 + $0x70] sm:$0xff]  ;;  %v62_v46 = vld [vmem:[%s518_s1 + $0x78] sm:$0xff] }
   0x8   :  { %v63_v49 = vld [vmem:[%s518_s1 + $0x80] sm:$0xff]  ;;  %v64_v51 = vld [vmem:[%s518_s1 + $0x88] sm:$0xff]  ;;  %v65_v55 = vld [vmem:[%s518_s1 + $0x90] sm:$0xff] }
   0x9   :  { %v66_v58 = vld [vmem:[%s518_s1 + $0x98] sm:$0xff]  ;;  %v67_v60 = vld [vmem:[%s518_s1 + $0xa0] sm:$0xff]  ;;  %v68_v0 = vld [vmem:[%s518_s1 + $0xa8] sm:$0xff] }
   0xa   :  { %v69_v3 = vld [vmem:[%s518_s1 + $0xb0] sm:$0xff]  ;;  %v70_v5 = vld [vmem:[%s518_s1 + $0xb8] sm:$0xff]  ;;  %v71_v9 = vld [vmem:[%s518_s1 + $0xc0] sm:$0xff] }
   0xc   :  { %v16_v14 = vld [vmem:[%s517_s0 + $0x28] sm:$0xff] }
   0xd   :  { %121 = vst.msk [vmem:[%s519_s2 + $0x8] sm:$0xff] %vm120_vm0, %v84_v7  ;;  %122 = vst [vmem:[%s519_s2 + $0x10] sm:$0xff] %v85_v8  ;;  %v88_v17 = vadd.f32 %v52_v15, %v16_v14  ;;  %v73_v14 = vld [vmem:[%s518_s1 + $0xd0] sm:$0xff] }
  0x14   :  { %v17_v18 = vld [vmem:[%s517_s0 + $0x30] sm:$0xff]  ;;  %v18_v20 = vld [vmem:[%s517_s0 + $0x38] sm:$0xff] }
  0x15   :  { %123 = vst.msk [vmem:[%s519_s2 + $0x18] sm:$0xff] %vm120_vm0, %v86_v12  ;;  %v89_v21 = vadd.f32 %v53_v19, %v17_v18  ;;  %v90_v25 = vadd.f32 %v54_v22, %v18_v20  ;;  %v72_v12 = vld [vmem:[%s518_s1 + $0xc8] sm:$0xff]  ;;  %v74_v18 = vld [vmem:[%s518_s1 + $0xd8] sm:$0xff] }
  0x1c   :  { %v19_v23 = vld [vmem:[%s517_s0 + $0x40] sm:$0xff] }
  0x1d   :  { %124 = vst [vmem:[%s519_s2 + $0x20] sm:$0xff] %v87_v16  ;;  %125 = vst.msk [vmem:[%s519_s2 + $0x28] sm:$0xff] %vm120_vm0, %v88_v17  ;;  %v91_v26 = vadd.f32 %v55_v24, %v19_v23  ;;  %v76_v23 = vld [vmem:[%s518_s1 + $0xe8] sm:$0xff] }
  0x24   :  { %v20_v27 = vld [vmem:[%s517_s0 + $0x48] sm:$0xff]  ;;  %v21_v29 = vld [vmem:[%s517_s0 + $0x50] sm:$0xff] }
  0x25   :  { %126 = vst [vmem:[%s519_s2 + $0x30] sm:$0xff] %v89_v21  ;;  %v92_v30 = vadd.f32 %v56_v28, %v20_v27  ;;  %v93_v34 = vadd.f32 %v57_v31, %v21_v29  ;;  %v75_v21 = vld [vmem:[%s518_s1 + $0xe0] sm:$0xff]  ;;  %v77_v27 = vld [vmem:[%s518_s1 + $0xf0] sm:$0xff] }
  0x2c   :  { %v22_v32 = vld [vmem:[%s517_s0 + $0x58] sm:$0xff] }
  0x2d   :  { %127 = vst.msk [vmem:[%s519_s2 + $0x38] sm:$0xff] %vm120_vm0, %v90_v25  ;;  %128 = vst [vmem:[%s519_s2 + $0x40] sm:$0xff] %v91_v26  ;;  %v94_v35 = vadd.f32 %v58_v33, %v22_v32  ;;  %v79_v32 = vld [vmem:[%s518_s1 + $0x100] sm:$0xff] }
  0x34   :  { %v23_v36 = vld [vmem:[%s517_s0 + $0x60] sm:$0xff]  ;;  %v24_v38 = vld [vmem:[%s517_s0 + $0x68] sm:$0xff] }
  0x35   :  { %129 = vst.msk [vmem:[%s519_s2 + $0x48] sm:$0xff] %vm120_vm0, %v92_v30  ;;  %v95_v39 = vadd.f32 %v59_v37, %v23_v36  ;;  %v96_v43 = vadd.f32 %v60_v40, %v24_v38  ;;  %v78_v30 = vld [vmem:[%s518_s1 + $0xf8] sm:$0xff]  ;;  %v80_v36 = vld [vmem:[%s518_s1 + $0x108] sm:$0xff] }
  0x3c   :  { %v25_v41 = vld [vmem:[%s517_s0 + $0x70] sm:$0xff] }
  0x3d   :  { %130 = vst [vmem:[%s519_s2 + $0x50] sm:$0xff] %v93_v34  ;;  %131 = vst.msk [vmem:[%s519_s2 + $0x58] sm:$0xff] %vm120_vm0, %v94_v35  ;;  %v97_v44 = vadd.f32 %v61_v42, %v25_v41  ;;  %v82_v41 = vld [vmem:[%s518_s1 + $0x118] sm:$0xff] }
  0x44   :  { %v26_v45 = vld [vmem:[%s517_s0 + $0x78] sm:$0xff]  ;;  %v27_v47 = vld [vmem:[%s517_s0 + $0x80] sm:$0xff] }
  0x45   :  { %132 = vst [vmem:[%s519_s2 + $0x60] sm:$0xff] %v95_v39  ;;  %v98_v48 = vadd.f32 %v62_v46, %v26_v45  ;;  %v99_v52 = vadd.f32 %v63_v49, %v27_v47  ;;  %v81_v39 = vld [vmem:[%s518_s1 + $0x110] sm:$0xff] }
  0x4c   :  { %v28_v50 = vld [vmem:[%s517_s0 + $0x88] sm:$0xff] }
  0x4d   :  { %133 = vst.msk [vmem:[%s519_s2 + $0x68] sm:$0xff] %vm120_vm0, %v96_v43  ;;  %134 = vst [vmem:[%s519_s2 + $0x70] sm:$0xff] %v97_v44  ;;  %v100_v53 = vadd.f32 %v64_v51, %v28_v50 }
  0x54   :  { %v29_v54 = vld [vmem:[%s517_s0 + $0x90] sm:$0xff]  ;;  %v30_v56 = vld [vmem:[%s517_s0 + $0x98] sm:$0xff] }
  0x55   :  { %135 = vst.msk [vmem:[%s519_s2 + $0x78] sm:$0xff] %vm120_vm0, %v98_v48  ;;  %v101_v57 = vadd.f32 %v65_v55, %v29_v54  ;;  %v102_v61 = vadd.f32 %v66_v58, %v30_v56 }
  0x5c   :  { %v31_v59 = vld [vmem:[%s517_s0 + $0xa0] sm:$0xff] }
  0x5d   :  { %136 = vst [vmem:[%s519_s2 + $0x80] sm:$0xff] %v99_v52  ;;  %137 = vst.msk [vmem:[%s519_s2 + $0x88] sm:$0xff] %vm120_vm0, %v100_v53  ;;  %v103_v62 = vadd.f32 %v67_v60, %v31_v59 }
  0x64   :  { %v32_v63 = vld [vmem:[%s517_s0 + $0xa8] sm:$0xff]  ;;  %v33_v1 = vld [vmem:[%s517_s0 + $0xb0] sm:$0xff] }
  0x65   :  { %138 = vst [vmem:[%s519_s2 + $0x90] sm:$0xff] %v101_v57  ;;  %v104_v2 = vadd.f32 %v68_v0, %v32_v63  ;;  %v105_v6 = vadd.f32 %v69_v3, %v33_v1 }
  0x6c   :  { %v34_v4 = vld [vmem:[%s517_s0 + $0xb8] sm:$0xff] }
  0x6d   :  { %139 = vst.msk [vmem:[%s519_s2 + $0x98] sm:$0xff] %vm120_vm0, %v102_v61  ;;  %140 = vst [vmem:[%s519_s2 + $0xa0] sm:$0xff] %v103_v62  ;;  %v106_v7 = vadd.f32 %v70_v5, %v34_v4 }
  0x74   :  { %v35_v8 = vld [vmem:[%s517_s0 + $0xc0] sm:$0xff]  ;;  %v36_v10 = vld [vmem:[%s517_s0 + $0xc8] sm:$0xff] }
  0x75   :  { %141 = vst.msk [vmem:[%s519_s2 + $0xa8] sm:$0xff] %vm120_vm0, %v104_v2  ;;  %v107_v11 = vadd.f32 %v71_v9, %v35_v8  ;;  %v108_v15 = vadd.f32 %v72_v12, %v36_v10 }
  0x7c   :  { %v37_v13 = vld [vmem:[%s517_s0 + $0xd0] sm:$0xff] }
  0x7d   :  { %142 = vst [vmem:[%s519_s2 + $0xb0] sm:$0xff] %v105_v6  ;;  %143 = vst.msk [vmem:[%s519_s2 + $0xb8] sm:$0xff] %vm120_vm0, %v106_v7  ;;  %v109_v16 = vadd.f32 %v73_v14, %v37_v13 }
  0x84   :  { %v38_v17 = vld [vmem:[%s517_s0 + $0xd8] sm:$0xff]  ;;  %v39_v19 = vld [vmem:[%s517_s0 + $0xe0] sm:$0xff] }
  0x85   :  { %144 = vst [vmem:[%s519_s2 + $0xc0] sm:$0xff] %v107_v11  ;;  %v110_v20 = vadd.f32 %v74_v18, %v38_v17  ;;  %v111_v24 = vadd.f32 %v75_v21, %v39_v19 }
  0x8c   :  { %v40_v22 = vld [vmem:[%s517_s0 + $0xe8] sm:$0xff] }
  0x8d   :  { %145 = vst.msk [vmem:[%s519_s2 + $0xc8] sm:$0xff] %vm120_vm0, %v108_v15  ;;  %146 = vst [vmem:[%s519_s2 + $0xd0] sm:$0xff] %v109_v16  ;;  %v112_v25 = vadd.f32 %v76_v23, %v40_v22 }
  0x94   :  { %v41_v26 = vld [vmem:[%s517_s0 + $0xf0] sm:$0xff]  ;;  %v42_v28 = vld [vmem:[%s517_s0 + $0xf8] sm:$0xff] }
  0x95   :  { %147 = vst.msk [vmem:[%s519_s2 + $0xd8] sm:$0xff] %vm120_vm0, %v110_v20  ;;  %v113_v29 = vadd.f32 %v77_v27, %v41_v26  ;;  %v114_v33 = vadd.f32 %v78_v30, %v42_v28 }
  0x9c   :  { %v43_v31 = vld [vmem:[%s517_s0 + $0x100] sm:$0xff] }
  0x9d   :  { %148 = vst [vmem:[%s519_s2 + $0xe0] sm:$0xff] %v111_v24  ;;  %149 = vst.msk [vmem:[%s519_s2 + $0xe8] sm:$0xff] %vm120_vm0, %v112_v25  ;;  %v115_v34 = vadd.f32 %v79_v32, %v43_v31 }
  0xa4   :  { %v44_v35 = vld [vmem:[%s517_s0 + $0x108] sm:$0xff]  ;;  %v45_v37 = vld [vmem:[%s517_s0 + $0x110] sm:$0xff] }
  0xa5   :  { %150 = vst [vmem:[%s519_s2 + $0xf0] sm:$0xff] %v113_v29  ;;  %v116_v38 = vadd.f32 %v80_v36, %v44_v35  ;;  %v117_v42 = vadd.f32 %v81_v39, %v45_v37 }
  0xac   :  { %v46_v40 = vld [vmem:[%s517_s0 + $0x118] sm:$0xff] }
  0xad   :  { %151 = vst.msk [vmem:[%s519_s2 + $0xf8] sm:$0xff] %vm120_vm0, %v114_v33  ;;  %152 = vst [vmem:[%s519_s2 + $0x100] sm:$0xff] %v115_v34  ;;  %v118_v43 = vadd.f32 %v82_v41, %v46_v40 }
  0xae   :  { %153 = vst.msk [vmem:[%s519_s2 + $0x108] sm:$0xff] %vm120_vm0, %v116_v38  ;;  %154 = vst [vmem:[%s519_s2 + $0x110] sm:$0xff] %v117_v42 }
  0xaf   :  { %155 = vst.msk [vmem:[%s519_s2 + $0x118] sm:$0xff] %vm120_vm0, %v118_v43 }

</bundles_post_ra>
